<compile_context>
chip_gen: v5e
topology: v5e:2x2
jax: 0.10.0
libtpu: 0.0.40
codegen_flags: <defaults>
</compile_context>

<pallas_src>
import functools

import numpy as np
import jax
import jax.numpy as jnp
from jax.experimental import pallas as pl
from jax.experimental.pallas import tpu as pltpu

LN_EPS = 1e-5
LANE = 128
LN_ROW0 = 4 * LANE            # row offset of the LayerNorm gamma/beta block
SLAB_ROWS = 4 * LANE + 8      # w1 | w2 | wd1 | wd2 | 8-row LN block


# --------------------------------------------------------------------------
# Pallas kernel: 4 MXU matmuls, full-width (128-lane) tiles end to end.
# --------------------------------------------------------------------------
def model2_kernel(x_ref, w_ref, out_ref, *, latent, batch):
    L, B = latent, batch

    lane = jax.lax.broadcasted_iota(jnp.int32, (B, LANE), 1)
    mask_lo = lane < L                                 # live lanes [0, L)
    one127 = (lane == LANE - 1).astype(jnp.float32)    # constant-1 lane (bias fold)
    inv_l = 1.0 / L

    def masked_ln(xfull, g_row, b_row):
        # LayerNorm over lanes [0, L) of a full (B, 128) tile; exact zeros
        # outside (gamma / beta rows are zero-padded beyond lane L).
        xm = jnp.where(mask_lo, xfull, 0.0)
        mu = jnp.sum(xm, axis=-1, keepdims=True) * inv_l
        xc = jnp.where(mask_lo, xfull - mu, 0.0)
        var = jnp.sum(xc * xc, axis=-1, keepdims=True) * inv_l
        g = w_ref[LN_ROW0 + g_row:LN_ROW0 + g_row + 1, :]
        b = w_ref[LN_ROW0 + b_row:LN_ROW0 + b_row + 1, :]
        return xc * jax.lax.rsqrt(var + LN_EPS) * g + b

    # stage 1: (encoder -> v_proj -> out_proj) for rna (rows [0,B)) and atac
    # (rows [B,2B)) in one matmul; biases ride on x's constant-1 lanes 126/127.
    s1 = jnp.dot(x_ref[...], w_ref[0:LANE, :],
                 preferred_element_type=jnp.float32)
    n1 = masked_ln(s1[0:B, :], 0, 1)                   # cross_attention_rna
    n2 = masked_ln(s1[B:2 * B, :] + n1, 2, 3)          # cross_attention_atac
    n2_aug = jnp.where(mask_lo, n2, one127)            # lane 127 := 1 (stage-2 bias)

    # stage 2: z path (Wv@Wo folded, +output_query via w2 row 127) and the
    # per-(head, head) attention-score inner products in one matmul.
    s2 = jnp.dot(n2_aug, w_ref[LANE:2 * LANE, :],
                 preferred_element_type=jnp.float32)
    z = masked_ln(s2, 4, 5)                            # cross_attention_z
    z_aug = jnp.where(mask_lo, z, one127)              # lane 127 := 1 (decoder biases)

    # merged rna/atac decoder (block-diagonal); hidden/output biases ride on the
    # constant-1 lane (h[:, 127] == relu(1) == 1).
    h = jnp.maximum(
        jnp.dot(z_aug, w_ref[2 * LANE:3 * LANE, :],
                preferred_element_type=jnp.float32), 0.0)
    dec = jnp.dot(h, w_ref[3 * LANE:4 * LANE, :],
                  preferred_element_type=jnp.float32)

    # lane-dense output, two full 128-lane (unmasked) stores:
    #   lanes [  0,128) = [ Z | u | 0 ... ]
    #   lanes [128,256) = [ rna_out | atac_out | 0 ... ]
    out_ref[:, 0:LANE] = jnp.where(mask_lo, z, s2)
    out_ref[:, LANE:2 * LANE] = dec


# --------------------------------------------------------------------------
# Parameters (deterministic, synthetic) -- mirrors the torch module layout.
# --------------------------------------------------------------------------
def init_params(key, input_dim_rna, input_dim_atac, latent_dim, hidden_dim,
                num_heads=2):
    del num_heads
    keys = iter(jax.random.split(key, 32))

    def nrm(shape, scale=0.1):
        return scale * jax.random.normal(next(keys), shape, dtype=jnp.float32)

    def attn_params():
        return dict(
            in_w=nrm((3 * latent_dim, latent_dim)),
            in_b=nrm((3 * latent_dim,)),
            out_w=nrm((latent_dim, latent_dim)),
            out_b=nrm((latent_dim,)),
            ln_g=jnp.ones((latent_dim,), jnp.float32),
            ln_b=jnp.zeros((latent_dim,), jnp.float32),
        )

    return dict(
        initial_query=jax.random.normal(next(keys), (latent_dim,), jnp.float32),
        output_query=jax.random.normal(next(keys), (latent_dim,), jnp.float32),
        rna_enc_w=nrm((latent_dim, input_dim_rna)),
        rna_enc_b=nrm((latent_dim,)),
        atac_enc_w=nrm((latent_dim, input_dim_atac)),
        atac_enc_b=nrm((latent_dim,)),
        ca_rna=attn_params(),
        ca_atac=attn_params(),
        ca_z=attn_params(),
        rna_dec_w1=nrm((hidden_dim, latent_dim)),
        rna_dec_b1=nrm((hidden_dim,)),
        rna_dec_w2=nrm((input_dim_rna, hidden_dim)),
        rna_dec_b2=nrm((input_dim_rna,)),
        atac_dec_w1=nrm((hidden_dim, latent_dim)),
        atac_dec_b1=nrm((hidden_dim,)),
        atac_dec_w2=nrm((input_dim_atac, hidden_dim)),
        atac_dec_b2=nrm((input_dim_atac,)),
    )


# --------------------------------------------------------------------------
# One-time host-side (numpy) algebraic folding + slab packing.
# --------------------------------------------------------------------------
def pack_params(params, *, num_heads, batch):
    f64 = np.float64
    L = int(params['initial_query'].shape[0])
    hidden = int(params['rna_dec_w1'].shape[0])
    d_rna = int(params['rna_dec_w2'].shape[0])
    d_atac = int(params['atac_dec_w2'].shape[0])
    d_in = d_rna + d_atac
    H = num_heads
    D = L // H

    # packing currently assumes everything fits a single 128-lane slab
    assert d_in <= LANE - 2, "inputs must fit 126 lanes (126/127 carry bias 1s)"
    assert L + H * H <= LANE and L < LANE
    assert 2 * hidden < LANE
    assert batch % H == 0, "score reshape path requires batch % num_heads == 0"
    # TODO(synk): generalize slab packing to feature dims > 126 lanes (keep the
    # weight slab bounded rather than quadratic so it still fits v7x's 64 MiB).

    def a(x):
        return np.asarray(x, f64)

    def fused_vo(p):
        # kv_len == 1 attention:  attn = value @ (Wv^T Wo^T) + (bv Wo^T + bo)
        wv, bv = a(p['in_w'])[2 * L:], a(p['in_b'])[2 * L:]
        wo, bo = a(p['out_w']), a(p['out_b'])
        return wv.T @ wo.T, bv @ wo.T + bo

    W_r, b_r = fused_vo(params['ca_rna'])
    W_a, b_a = fused_vo(params['ca_atac'])
    W_z, b_z = fused_vo(params['ca_z'])

    # fold the encoders into the rna/atac value paths
    A_rna = a(params['rna_enc_w']).T @ W_r                     # (d_rna, L)
    c_rna = a(params['rna_enc_b']) @ W_r + b_r                 # (L,)
    A_atac = a(params['atac_enc_w']).T @ W_a                   # (d_atac, L)
    c_atac = a(params['atac_enc_b']) @ W_a + b_a               # (L,)

    iq = a(params['initial_query'])
    oq = a(params['output_query'])

    # attention-score weights: (N @ wqs.T)[b, p*H+s] = sum_d oq[p*D+d]*N[b,s*D+d]/sqrt(D)
    blocks = oq.reshape(H, D)
    eye = np.eye(H)
    wqs = (blocks[:, None, None, :] * eye[None, :, :, None]).reshape(
        H * H, L) / np.sqrt(D)

    slab = np.zeros((SLAB_ROWS, LANE), f64)

    # --- w1 (rows 0:128): block-diag stage-1 + bias rows 126 (rna) / 127 (atac)
    w1 = slab[0:LANE]
    w1[0:d_rna, 0:L] = A_rna
    w1[d_rna:d_in, 0:L] = A_atac
    w1[LANE - 2, 0:L] = c_rna + iq
    w1[LANE - 1, 0:L] = c_atac

    # --- w2 (rows 128:256): z path + score columns + bias row 127
    w2 = slab[LANE:2 * LANE]
    w2[0:L, 0:L] = W_z
    w2[0:L, L:L + H * H] = wqs.T
    w2[LANE - 1, 0:L] = b_z + oq
    # the wrapper relies on the u-tail lanes staying exactly zero:
    assert not slab[LANE:2 * LANE, L + H * H:].any()

    # --- wd1 (rows 256:384): merged decoder hidden + bias row 127 + one-lane
    wd1 = slab[2 * LANE:3 * LANE]
    wd1[0:L, 0:hidden] = a(params['rna_dec_w1']).T
    wd1[0:L, hidden:2 * hidden] = a(params['atac_dec_w1']).T
    wd1[LANE - 1, 0:hidden] = a(params['rna_dec_b1'])
    wd1[LANE - 1, hidden:2 * hidden] = a(params['atac_dec_b1'])
    wd1[LANE - 1, LANE - 1] = 1.0          # keeps h[:, 127] == 1 after ReLU

    # --- wd2 (rows 384:512): block-diag decoder output + bias row 127
    wd2 = slab[3 * LANE:4 * LANE]
    wd2[0:hidden, 0:d_rna] = a(params['rna_dec_w2']).T
    wd2[hidden:2 * hidden, d_rna:d_in] = a(params['atac_dec_w2']).T
    wd2[LANE - 1, 0:d_rna] = a(params['rna_dec_b2'])
    wd2[LANE - 1, d_rna:d_in] = a(params['atac_dec_b2'])

    # --- LN rows (rows 512:518): gamma/beta, zero-padded beyond lane L
    ln = slab[LN_ROW0:]
    ln[0, 0:L] = a(params['ca_rna']['ln_g'])
    ln[1, 0:L] = a(params['ca_rna']['ln_b'])
    ln[2, 0:L] = a(params['ca_atac']['ln_g'])
    ln[3, 0:L] = a(params['ca_atac']['ln_b'])
    ln[4, 0:L] = a(params['ca_z']['ln_g'])
    ln[5, 0:L] = a(params['ca_z']['ln_b'])

    # --- per-call input slab template: the two constant-1 bias lanes preset
    x_base = np.zeros((2 * batch, LANE), np.float32)
    x_base[:batch, LANE - 2] = 1.0
    x_base[batch:, LANE - 1] = 1.0

    return dict(
        wslab=jnp.asarray(slab.astype(np.float32)),
        x_base=jnp.asarray(x_base),
        latent=L, hidden=hidden, d_rna=d_rna, d_atac=d_atac,
        num_heads=H, batch=batch)


# --------------------------------------------------------------------------
# Forward builder: one pallas_call, minimal per-call glue, all under jax.jit.
# --------------------------------------------------------------------------
def make_model2_forward(packed):
    wslab = packed['wslab']
    x_base = packed['x_base']
    L = packed['latent']
    d_rna = packed['d_rna']
    d_atac = packed['d_atac']
    H = packed['num_heads']
    B = packed['batch']
    d_in = d_rna + d_atac

    vmem = pl.BlockSpec(memory_space=pltpu.MemorySpace.VMEM)
    kern = pl.pallas_call(
        functools.partial(model2_kernel, latent=L, batch=B),
        out_shape=jax.ShapeDtypeStruct((B, 2 * LANE), jnp.float32),
        in_specs=[vmem, vmem],
        out_specs=vmem,
    )

    @jax.jit
    def forward(input_rna, input_atac, position=None, m1=None, m2=None):
        del position, m1, m2        # unused by the torch forward as well
        x2 = x_base.at[:B, :d_rna].set(input_rna.astype(jnp.float32))
        x2 = x2.at[B:, d_rna:d_in].set(input_atac.astype(jnp.float32))
        out = kern(x2, wslab)

        z = out[:, :L]
        u = out[:, L:L + H * H]
        rna_out = out[:, LANE:LANE + d_rna]
        atac_out = out[:, LANE + d_rna:LANE + d_in]

        # score (1, H, B, B): fixed affine re-indexing of u -- reshape /
        # transpose / broadcast only, no gather.  Requires B % H == 0.
        w = u.reshape(H, B // H, H, H)           # [h, j1, i0, j0]
        w = jnp.transpose(w, (0, 2, 1, 3))       # [h, i0, j1, j0]
        score = jnp.broadcast_to(w[:, None], (H, B // H, H, B // H, H))
        score = score.reshape(1, H, B, B)
        return z, rna_out, atac_out, 0, 0, score

    return forward


# --------------------------------------------------------------------------
# Pure-numpy (float64) reference that mirrors the torch code literally.
# --------------------------------------------------------------------------
def model2_reference_np(params, input_rna, input_atac, num_heads=2):
    f64 = np.float64
    p = {k: ({kk: np.asarray(vv, f64) for kk, vv in v.items()}
             if isinstance(v, dict) else np.asarray(v, f64))
         for k, v in params.items()}
    rna = np.asarray(input_rna, f64)
    atac = np.asarray(input_atac, f64)
    B = rna.shape[0]
    L = p['initial_query'].shape[0]
    H = num_heads
    D = L // H

    def linear(x, w, b):
        return x @ w.T + b

    def layer_norm(x, g, b, eps=LN_EPS):
        mu = x.mean(-1, keepdims=True)
        var = ((x - mu) ** 2).mean(-1, keepdims=True)
        return (x - mu) / np.sqrt(var + eps) * g + b

    def mha(q, k, v, ap):                # torch MHA, (seq, batch, embed) layout
        S, Bb, Ld = q.shape
        hd = Ld // H
        wq, wk, wv = np.split(ap['in_w'], 3, axis=0)
        bq, bk, bv = np.split(ap['in_b'], 3, axis=0)
        qp, kp, vp = linear(q, wq, bq), linear(k, wk, bk), linear(v, wv, bv)

        def heads(x):
            return x.reshape(S, Bb * H, hd).transpose(1, 0, 2)

        qh, kh, vh = heads(qp), heads(kp), heads(vp)
        sc = qh @ kh.transpose(0, 2, 1) / np.sqrt(hd)
        sc = sc - sc.max(-1, keepdims=True)
        w = np.exp(sc)
        w = w / w.sum(-1, keepdims=True)
        o = (w @ vh).transpose(1, 0, 2).reshape(S, Bb, Ld)
        return linear(o, ap['out_w'], ap['out_b'])

    def cross(q, k, v, ap):
        return layer_norm(mha(q, k, v, ap) + q, ap['ln_g'], ap['ln_b'])

    N = np.broadcast_to(p['initial_query'], (B, L))[None]
    x_rna = linear(rna, p['rna_enc_w'], p['rna_enc_b'])[None]
    x_atac = linear(atac, p['atac_enc_w'], p['atac_enc_b'])[None]
    N = cross(N, x_rna, x_rna, p['ca_rna'])
    N = cross(N, x_atac, x_atac, p['ca_atac'])
    oq = np.broadcast_to(p['output_query'], (B, L))[None]
    Z = cross(oq, N, N, p['ca_z'])

    qr = oq.reshape(1, H, B, D)
    kr = N.reshape(1, H, B, D)
    score = qr @ np.swapaxes(kr, -1, -2) / np.sqrt(D)

    Z2 = Z[0]
    h1 = np.maximum(linear(Z2, p['rna_dec_w1'], p['rna_dec_b1']), 0.0)
    out_rna = linear(h1, p['rna_dec_w2'], p['rna_dec_b2'])
    h2 = np.maximum(linear(Z2, p['atac_dec_w1'], p['atac_dec_b1']), 0.0)
    out_atac = linear(h2, p['atac_dec_w2'], p['atac_dec_b2'])
    return Z2, out_rna, out_atac, score


# --------------------------------------------------------------------------
if __name__ == "__main__":
    key = jax.random.PRNGKey(0)
    k_param, k_rna, k_atac = jax.random.split(key, 3)

    batch, d_rna, d_atac, latent, hidden, heads = 8, 48, 64, 32, 40, 2
    params = init_params(k_param, d_rna, d_atac, latent, hidden, heads)
    input_rna = jax.random.normal(k_rna, (batch, d_rna), jnp.float32)
    input_atac = jax.random.normal(k_atac, (batch, d_atac), jnp.float32)
    position = jnp.zeros((batch, 2), jnp.float32)   # unused by forward
    m1 = jnp.zeros((batch, batch), jnp.float32)     # unused by forward
    m2 = jnp.zeros((batch, batch), jnp.float32)     # unused by forward

    packed = pack_params(params, num_heads=heads, batch=batch)   # one-time
    forward = make_model2_forward(packed)                        # one-time

    z, out_rna, out_atac, s_rna, s_atac, score = forward(
        input_rna, input_atac, position, m1, m2)
    jax.block_until_ready(z)
    jax.block_until_ready(score)

    z_r, rna_r, atac_r, score_r = model2_reference_np(
        params, input_rna, input_atac, heads)
    for got, want in ((z, z_r), (out_rna, rna_r), (out_atac, atac_r),
                      (score, score_r)):
        assert got.shape == tuple(want.shape), (got.shape, want.shape)
        np.testing.assert_allclose(np.asarray(got, np.float64), want,
                                   rtol=2e-3, atol=2e-3)
    assert int(s_rna) == 0 and int(s_atac) == 0

    print("KERNEL_OK")
</pallas_src>

<mosaic_0001>
module attributes {stable_mosaic.version = 11 : i64} {
  func.func @model2_kernel(%arg0: memref<16x128xf32, #tpu.memory_space<vmem>>, %arg1: memref<520x128xf32, #tpu.memory_space<vmem>>, %arg2: memref<8x256xf32, #tpu.memory_space<vmem>>) attributes {dimension_semantics = [], scalar_prefetch = 0 : i64, scratch_operands = 0 : i64, tpu.core_type = #tpu.core_type<tc>} {
    %0 = tpu.iota {dimensions = array<i32: 1>} : vector<8x128xi32>
    %c32_i32 = arith.constant 32 : i32
    %1 = vector.broadcast %c32_i32 : i32 to vector<8x128xi32>
    %2 = arith.cmpi slt, %0, %1 : vector<8x128xi32>
    %c127_i32 = arith.constant 127 : i32
    %3 = vector.broadcast %c127_i32 : i32 to vector<8x128xi32>
    %4 = arith.cmpi eq, %0, %3 : vector<8x128xi32>
    %5 = arith.extui %4 : vector<8x128xi1> to vector<8x128xi32>
    %6 = arith.sitofp %5 : vector<8x128xi32> to vector<8x128xf32>
    %c0 = arith.constant 0 : index
    %c0_0 = arith.constant 0 : index
    %7 = vector.load %arg0[%c0, %c0_0] : memref<16x128xf32, #tpu.memory_space<vmem>>, vector<16x128xf32>
    %c0_1 = arith.constant 0 : index
    %c0_2 = arith.constant 0 : index
    %8 = vector.load %arg1[%c0_1, %c0_2] : memref<520x128xf32, #tpu.memory_space<vmem>>, vector<128x128xf32>
    %cst = arith.constant dense<0.000000e+00> : vector<16x128xf32>
    %9 = tpu.matmul %7, %8, %cst {dimension_numbers = #tpu.dot_dimension_numbers<[1], [0], [0], [1], [0, 0, 1, 1], [], []>} : vector<16x128xf32>, vector<128x128xf32>, vector<16x128xf32> -> vector<16x128xf32>
    %10 = vector.extract_strided_slice %9 {offsets = [0, 0], sizes = [8, 128], strides = [1, 1]} : vector<16x128xf32> to vector<8x128xf32>
    %cst_3 = arith.constant 0.000000e+00 : f32
    %11 = vector.broadcast %cst_3 : f32 to vector<8x128xf32>
    %12 = arith.select %2, %10, %11 : vector<8x128xi1>, vector<8x128xf32>
    %cst_4 = arith.constant dense<0.000000e+00> : vector<8xf32>
    %13 = vector.multi_reduction <add>, %12, %cst_4 [1] : vector<8x128xf32> to vector<8xf32>
    %14 = vector.shape_cast %13 : vector<8xf32> to vector<8x1xf32>
    %cst_5 = arith.constant 3.125000e-02 : f32
    %15 = vector.broadcast %cst_5 : f32 to vector<8x1xf32>
    %16 = arith.mulf %14, %15 : vector<8x1xf32>
    %17 = vector.broadcast %16 : vector<8x1xf32> to vector<8x128xf32>
    %18 = arith.subf %10, %17 : vector<8x128xf32>
    %cst_6 = arith.constant 0.000000e+00 : f32
    %19 = vector.broadcast %cst_6 : f32 to vector<8x128xf32>
    %20 = arith.select %2, %18, %19 : vector<8x128xi1>, vector<8x128xf32>
    %21 = arith.mulf %20, %20 : vector<8x128xf32>
    %cst_7 = arith.constant dense<0.000000e+00> : vector<8xf32>
    %22 = vector.multi_reduction <add>, %21, %cst_7 [1] : vector<8x128xf32> to vector<8xf32>
    %23 = vector.shape_cast %22 : vector<8xf32> to vector<8x1xf32>
    %cst_8 = arith.constant 3.125000e-02 : f32
    %24 = vector.broadcast %cst_8 : f32 to vector<8x1xf32>
    %25 = arith.mulf %23, %24 : vector<8x1xf32>
    %c512 = arith.constant 512 : index
    %c0_9 = arith.constant 0 : index
    %26 = vector.load %arg1[%c512, %c0_9] : memref<520x128xf32, #tpu.memory_space<vmem>>, vector<1x128xf32>
    %c513 = arith.constant 513 : index
    %c0_10 = arith.constant 0 : index
    %27 = vector.load %arg1[%c513, %c0_10] : memref<520x128xf32, #tpu.memory_space<vmem>>, vector<1x128xf32>
    %cst_11 = arith.constant 9.99999974E-6 : f32
    %28 = vector.broadcast %cst_11 : f32 to vector<8x1xf32>
    %29 = arith.addf %25, %28 : vector<8x1xf32>
    %30 = math.rsqrt %29 : vector<8x1xf32>
    %31 = vector.broadcast %30 : vector<8x1xf32> to vector<8x128xf32>
    %32 = arith.mulf %20, %31 : vector<8x128xf32>
    %33 = vector.broadcast %26 : vector<1x128xf32> to vector<8x128xf32>
    %34 = arith.mulf %32, %33 : vector<8x128xf32>
    %35 = vector.broadcast %27 : vector<1x128xf32> to vector<8x128xf32>
    %36 = arith.addf %34, %35 : vector<8x128xf32>
    %37 = vector.extract_strided_slice %9 {offsets = [8, 0], sizes = [8, 128], strides = [1, 1]} : vector<16x128xf32> to vector<8x128xf32>
    %38 = arith.addf %37, %36 : vector<8x128xf32>
    %cst_12 = arith.constant 0.000000e+00 : f32
    %39 = vector.broadcast %cst_12 : f32 to vector<8x128xf32>
    %40 = arith.select %2, %38, %39 : vector<8x128xi1>, vector<8x128xf32>
    %cst_13 = arith.constant dense<0.000000e+00> : vector<8xf32>
    %41 = vector.multi_reduction <add>, %40, %cst_13 [1] : vector<8x128xf32> to vector<8xf32>
    %42 = vector.shape_cast %41 : vector<8xf32> to vector<8x1xf32>
    %cst_14 = arith.constant 3.125000e-02 : f32
    %43 = vector.broadcast %cst_14 : f32 to vector<8x1xf32>
    %44 = arith.mulf %42, %43 : vector<8x1xf32>
    %45 = vector.broadcast %44 : vector<8x1xf32> to vector<8x128xf32>
    %46 = arith.subf %38, %45 : vector<8x128xf32>
    %cst_15 = arith.constant 0.000000e+00 : f32
    %47 = vector.broadcast %cst_15 : f32 to vector<8x128xf32>
    %48 = arith.select %2, %46, %47 : vector<8x128xi1>, vector<8x128xf32>
    %49 = arith.mulf %48, %48 : vector<8x128xf32>
    %cst_16 = arith.constant dense<0.000000e+00> : vector<8xf32>
    %50 = vector.multi_reduction <add>, %49, %cst_16 [1] : vector<8x128xf32> to vector<8xf32>
    %51 = vector.shape_cast %50 : vector<8xf32> to vector<8x1xf32>
    %cst_17 = arith.constant 3.125000e-02 : f32
    %52 = vector.broadcast %cst_17 : f32 to vector<8x1xf32>
    %53 = arith.mulf %51, %52 : vector<8x1xf32>
    %c514 = arith.constant 514 : index
    %c0_18 = arith.constant 0 : index
    %54 = vector.load %arg1[%c514, %c0_18] : memref<520x128xf32, #tpu.memory_space<vmem>>, vector<1x128xf32>
    %c515 = arith.constant 515 : index
    %c0_19 = arith.constant 0 : index
    %55 = vector.load %arg1[%c515, %c0_19] : memref<520x128xf32, #tpu.memory_space<vmem>>, vector<1x128xf32>
    %cst_20 = arith.constant 9.99999974E-6 : f32
    %56 = vector.broadcast %cst_20 : f32 to vector<8x1xf32>
    %57 = arith.addf %53, %56 : vector<8x1xf32>
    %58 = math.rsqrt %57 : vector<8x1xf32>
    %59 = vector.broadcast %58 : vector<8x1xf32> to vector<8x128xf32>
    %60 = arith.mulf %48, %59 : vector<8x128xf32>
    %61 = vector.broadcast %54 : vector<1x128xf32> to vector<8x128xf32>
    %62 = arith.mulf %60, %61 : vector<8x128xf32>
    %63 = vector.broadcast %55 : vector<1x128xf32> to vector<8x128xf32>
    %64 = arith.addf %62, %63 : vector<8x128xf32>
    %65 = arith.select %2, %64, %6 : vector<8x128xi1>, vector<8x128xf32>
    %c128 = arith.constant 128 : index
    %c0_21 = arith.constant 0 : index
    %66 = vector.load %arg1[%c128, %c0_21] : memref<520x128xf32, #tpu.memory_space<vmem>>, vector<128x128xf32>
    %cst_22 = arith.constant dense<0.000000e+00> : vector<8x128xf32>
    %67 = tpu.matmul %65, %66, %cst_22 {dimension_numbers = #tpu.dot_dimension_numbers<[1], [0], [0], [1], [0, 0, 1, 1], [], []>} : vector<8x128xf32>, vector<128x128xf32>, vector<8x128xf32> -> vector<8x128xf32>
    %cst_23 = arith.constant 0.000000e+00 : f32
    %68 = vector.broadcast %cst_23 : f32 to vector<8x128xf32>
    %69 = arith.select %2, %67, %68 : vector<8x128xi1>, vector<8x128xf32>
    %cst_24 = arith.constant dense<0.000000e+00> : vector<8xf32>
    %70 = vector.multi_reduction <add>, %69, %cst_24 [1] : vector<8x128xf32> to vector<8xf32>
    %71 = vector.shape_cast %70 : vector<8xf32> to vector<8x1xf32>
    %cst_25 = arith.constant 3.125000e-02 : f32
    %72 = vector.broadcast %cst_25 : f32 to vector<8x1xf32>
    %73 = arith.mulf %71, %72 : vector<8x1xf32>
    %74 = vector.broadcast %73 : vector<8x1xf32> to vector<8x128xf32>
    %75 = arith.subf %67, %74 : vector<8x128xf32>
    %cst_26 = arith.constant 0.000000e+00 : f32
    %76 = vector.broadcast %cst_26 : f32 to vector<8x128xf32>
    %77 = arith.select %2, %75, %76 : vector<8x128xi1>, vector<8x128xf32>
    %78 = arith.mulf %77, %77 : vector<8x128xf32>
    %cst_27 = arith.constant dense<0.000000e+00> : vector<8xf32>
    %79 = vector.multi_reduction <add>, %78, %cst_27 [1] : vector<8x128xf32> to vector<8xf32>
    %80 = vector.shape_cast %79 : vector<8xf32> to vector<8x1xf32>
    %cst_28 = arith.constant 3.125000e-02 : f32
    %81 = vector.broadcast %cst_28 : f32 to vector<8x1xf32>
    %82 = arith.mulf %80, %81 : vector<8x1xf32>
    %c516 = arith.constant 516 : index
    %c0_29 = arith.constant 0 : index
    %83 = vector.load %arg1[%c516, %c0_29] : memref<520x128xf32, #tpu.memory_space<vmem>>, vector<1x128xf32>
    %c517 = arith.constant 517 : index
    %c0_30 = arith.constant 0 : index
    %84 = vector.load %arg1[%c517, %c0_30] : memref<520x128xf32, #tpu.memory_space<vmem>>, vector<1x128xf32>
    %cst_31 = arith.constant 9.99999974E-6 : f32
    %85 = vector.broadcast %cst_31 : f32 to vector<8x1xf32>
    %86 = arith.addf %82, %85 : vector<8x1xf32>
    %87 = math.rsqrt %86 : vector<8x1xf32>
    %88 = vector.broadcast %87 : vector<8x1xf32> to vector<8x128xf32>
    %89 = arith.mulf %77, %88 : vector<8x128xf32>
    %90 = vector.broadcast %83 : vector<1x128xf32> to vector<8x128xf32>
    %91 = arith.mulf %89, %90 : vector<8x128xf32>
    %92 = vector.broadcast %84 : vector<1x128xf32> to vector<8x128xf32>
    %93 = arith.addf %91, %92 : vector<8x128xf32>
    %94 = arith.select %2, %93, %6 : vector<8x128xi1>, vector<8x128xf32>
    %c256 = arith.constant 256 : index
    %c0_32 = arith.constant 0 : index
    %95 = vector.load %arg1[%c256, %c0_32] : memref<520x128xf32, #tpu.memory_space<vmem>>, vector<128x128xf32>
    %cst_33 = arith.constant dense<0.000000e+00> : vector<8x128xf32>
    %96 = tpu.matmul %94, %95, %cst_33 {dimension_numbers = #tpu.dot_dimension_numbers<[1], [0], [0], [1], [0, 0, 1, 1], [], []>} : vector<8x128xf32>, vector<128x128xf32>, vector<8x128xf32> -> vector<8x128xf32>
    %cst_34 = arith.constant 0.000000e+00 : f32
    %97 = vector.broadcast %cst_34 : f32 to vector<8x128xf32>
    %98 = arith.maximumf %96, %97 : vector<8x128xf32>
    %c384 = arith.constant 384 : index
    %c0_35 = arith.constant 0 : index
    %99 = vector.load %arg1[%c384, %c0_35] : memref<520x128xf32, #tpu.memory_space<vmem>>, vector<128x128xf32>
    %cst_36 = arith.constant dense<0.000000e+00> : vector<8x128xf32>
    %100 = tpu.matmul %98, %99, %cst_36 {dimension_numbers = #tpu.dot_dimension_numbers<[1], [0], [0], [1], [0, 0, 1, 1], [], []>} : vector<8x128xf32>, vector<128x128xf32>, vector<8x128xf32> -> vector<8x128xf32>
    %101 = arith.select %2, %93, %67 : vector<8x128xi1>, vector<8x128xf32>
    %c0_37 = arith.constant 0 : index
    %c0_38 = arith.constant 0 : index
    %102 = vector.load %arg2[%c0_37, %c0_38] : memref<8x256xf32, #tpu.memory_space<vmem>>, vector<8x128xf32>
    tpu.vector_store %arg2[%c0_37, %c0_38], %101 {strides = array<i32>} : memref<8x256xf32, #tpu.memory_space<vmem>>, vector<8x128xf32>,
    %c0_39 = arith.constant 0 : index
    %c128_40 = arith.constant 128 : index
    %103 = vector.load %arg2[%c0_39, %c128_40] : memref<8x256xf32, #tpu.memory_space<vmem>>, vector<8x128xf32>
    tpu.vector_store %arg2[%c0_39, %c128_40], %100 {strides = array<i32>} : memref<8x256xf32, #tpu.memory_space<vmem>>, vector<8x128xf32>,
    return
  }
}

</mosaic_0001>

<bundles_post_ra>
// kernel: forward.1
= control target key start
LH: loop header
LB: loop body
LE: loop exit
PB: predicated region body
PF: predicated region fallthrough
CT: control target
= control target key end

     0   :  { %7 = vsyncpa [#allocation3], 0  ;;  %s321_s12 = smov [#allocation2]   ;;  %s322_s14 = smov 128   ;;  %s391_s0 = inlined_call_operand.vmem [shape: f32[16,128], index: 0, kind: input, shape index: {}]   ;;  %s392_s1 = inlined_call_operand.hbm [shape: f32[520,128], index: 1, kind: input, shape index: {}]   ;;  %s393_s2 = inlined_call_operand.vmem [shape: f32[8,256], index: 2, kind: output, shape index: {}]  }
   0x1   :  { %s14_s11 = sshll.u32 %s392_s1, 4  ;;  %s16_s13 = sshll.u32 %s321_s12, 4  ;;  %s15_s11 = int_to_ptr.hbm [resolvable:$true] %s14_s11  ;;  %s17_s13 = int_to_ptr.vmem [resolvable:$true] %s16_s13 }
   0x2   :  { %s323_s15 = smov 8  }
   0x3   :  { %22 = dma.hbm_to_vmem [thread:$0]  %s15_s11, 8320, %s17_s13, [#allocation3], %s322_s14, %s322_s14, %s323_s15  }
   0x4   :  { %319 = dma.done.wait [#allocation3], 8320  }
   0x5   :  { %320 = vsyncadd [#allocation3], 4294958976  ;;  %v50_v0 = vld [vmem:[#allocation2 + $0x78] sm:$0xff]  ;;  %v49_v1 = vld [vmem:[#allocation2 + $0x70] sm:$0xff]  ;;  %v27_v17 = vlaneseq }
   0x6   :  { %51 = vmatpush.msra.mxu0 %v50_v0  ;;  %v48_v2 = vld [vmem:[#allocation2 + $0x68] sm:$0xff]  ;;  %v47_v3 = vld [vmem:[#allocation2 + $0x60] sm:$0xff]  ;;  %v46_v4 = vld [vmem:[#allocation2 + $0x58] sm:$0xff] }
   0x7   :  { %v45_v5 = vld [vmem:[#allocation2 + $0x50] sm:$0xff]  ;;  %v44_v6 = vld [vmem:[#allocation2 + $0x48] sm:$0xff]  ;;  %v43_v7 = vld [vmem:[#allocation2 + $0x40] sm:$0xff]  ;;  %v346_v18 = vand.u32 127, %v27_v17 }
   0x8   :  { %52 = vmatpush.msra.mxu0 %v49_v1  ;;  %v42_v8 = vld [vmem:[#allocation2 + $0x38] sm:$0xff]  ;;  %v41_v9 = vld [vmem:[#allocation2 + $0x30] sm:$0xff]  ;;  %v40_v10 = vld [vmem:[#allocation2 + $0x28] sm:$0xff] }
   0x9   :  { %v39_v11 = vld [vmem:[#allocation2 + $0x20] sm:$0xff]  ;;  %v38_v12 = vld [vmem:[#allocation2 + $0x18] sm:$0xff]  ;;  %v37_v13 = vld [vmem:[#allocation2 + $0x10] sm:$0xff]  ;;  %vm29_vm0 = vcmp.lt.s32.totalorder %v346_v18, 32  ;;  %vm30_vm7 = vcmp.eq.s32.totalorder %v346_v18, 127 }
   0xa   :  { %53 = vmatpush.msra.mxu0 %v48_v2  ;;  %v36_v14 = vld [vmem:[#allocation2 + $0x8] sm:$0xff]  ;;  %v35_v15 = vld [vmem:[#allocation2] sm:$0xff]  ;;  %v147_v45 = vld [vmem:[#allocation2 + $0xf8] sm:$0xff] }
   0xb   :  { %v33_v16 = vld [vmem:[%s391_s0] sm:$0xff]  ;;  %v34_v21 = vld [vmem:[%s391_s0 + $0x8] sm:$0xff]  ;;  %148 = vmatpush.msra.mxu1 %v147_v45  ;;  %v146_v51 = vld [vmem:[#allocation2 + $0xf0] sm:$0xff] }
   0xc   :  { %54 = vmatpush.msra.mxu0 %v47_v3  ;;  %v283_v36 = vld [vmem:[#allocation2 + $0x200] ss:$0 sm:$0xff]  ;;  %v284_v39 = vld [vmem:[#allocation2 + $0x201] ss:$0 sm:$0xff]  ;;  %v145_v52 = vld [vmem:[#allocation2 + $0xe8] sm:$0xff] }
   0xd   :  { %149 = vmatpush.msra.mxu1 %v146_v51  ;;  %v144_v53 = vld [vmem:[#allocation2 + $0xe0] sm:$0xff]  ;;  %v143_v54 = vld [vmem:[#allocation2 + $0xd8] sm:$0xff]  ;;  %v142_v55 = vld [vmem:[#allocation2 + $0xd0] sm:$0xff] }
   0xe   :  { %55 = vmatpush.msra.mxu0 %v46_v4  ;;  %v141_v56 = vld [vmem:[#allocation2 + $0xc8] sm:$0xff]  ;;  %v140_v57 = vld [vmem:[#allocation2 + $0xc0] sm:$0xff]  ;;  %v139_v58 = vld [vmem:[#allocation2 + $0xb8] sm:$0xff] }
   0xf   :  { %150 = vmatpush.msra.mxu1 %v145_v52  ;;  %v138_v59 = vld [vmem:[#allocation2 + $0xb0] sm:$0xff]  ;;  %v137_v60 = vld [vmem:[#allocation2 + $0xa8] sm:$0xff]  ;;  %v136_v61 = vld [vmem:[#allocation2 + $0xa0] sm:$0xff] }
  0x10   :  { %56 = vmatpush.msra.mxu0 %v45_v5  ;;  %v135_v62 = vld [vmem:[#allocation2 + $0x98] sm:$0xff]  ;;  %v134_v63 = vld [vmem:[#allocation2 + $0x90] sm:$0xff]  ;;  %v133_v0 = vld [vmem:[#allocation2 + $0x88] sm:$0xff] }
  0x11   :  { %151 = vmatpush.msra.mxu1 %v144_v53  ;;  %v132_v1 = vld [vmem:[#allocation2 + $0x80] sm:$0xff]  ;;  %v248_v45 = vld [vmem:[#allocation2 + $0x1f0] sm:$0xff]  ;;  %v245_v51 = vld [vmem:[#allocation2 + $0x1d8] sm:$0xff] }
  0x12   :  { %57 = vmatpush.msra.mxu0 %v44_v6  ;;  %v244_v52 = vld [vmem:[#allocation2 + $0x1d0] sm:$0xff]  ;;  %v243_v53 = vld [vmem:[#allocation2 + $0x1c8] sm:$0xff] }
  0x13   :  { %152 = vmatpush.msra.mxu1 %v143_v54  ;;  %v242_v54 = vld [vmem:[#allocation2 + $0x1c0] sm:$0xff] }
  0x14   :  { %58 = vmatpush.msra.mxu0 %v43_v7 }
  0x15   :  { %153 = vmatpush.msra.mxu1 %v142_v55 }
  0x16   :  { %59 = vmatpush.msra.mxu0 %v42_v8 }
  0x17   :  { %154 = vmatpush.msra.mxu1 %v141_v56 }
  0x18   :  { %60 = vmatpush.msra.mxu0 %v41_v9 }
  0x19   :  { %155 = vmatpush.msra.mxu1 %v140_v57  ;;  %v241_v57 = vld [vmem:[#allocation2 + $0x1b8] sm:$0xff] }
  0x1a   :  { %61 = vmatpush.msra.mxu0 %v40_v10 }
  0x1b   :  { %156 = vmatpush.msra.mxu1 %v139_v58 }
  0x1c   :  { %62 = vmatpush.msra.mxu0 %v39_v11  ;;  %v285_v11 = vld [vmem:[#allocation2 + $0x202] ss:$0 sm:$0xff] }
  0x1d   :  { %157 = vmatpush.msra.mxu1 %v138_v59  ;;  %v240_v59 = vld [vmem:[#allocation2 + $0x1b0] sm:$0xff] }
  0x1e   :  { %63 = vmatpush.msra.mxu0 %v38_v12 }
  0x1f   :  { %158 = vmatpush.msra.mxu1 %v137_v60 }
  0x20   :  { %64 = vmatpush.msra.mxu0 %v37_v13 }
  0x21   :  { %159 = vmatpush.msra.mxu1 %v136_v61  ;;  %v239_v61 = vld [vmem:[#allocation2 + $0x1a8] sm:$0xff] }
  0x22   :  { %65 = vmatpush.msra.mxu0 %v36_v14  ;;  %v286_v14 = vld [vmem:[#allocation2 + $0x203] ss:$0 sm:$0xff] }
  0x23   :  { %160 = vmatpush.msra.mxu1 %v135_v62 }
  0x24   :  { %66 = vmatpush.msra.mxu0 %v35_v15 }
  0x25   :  { %67 = vmatmul.f32.vlgmr.msra.gmra.mxu0 %v33_v16  ;;  %161 = vmatpush.msra.mxu1 %v134_v63  ;;  %v324_v16 = vmov 0.0   ;;  %v238_v63 = vld [vmem:[#allocation2 + $0x1a0] sm:$0xff] }
  0x26   :  { %v361_v17 = vsel %vm30_vm7, 1.0, %v324_v16 }
  0x27   :  { %162 = vmatpush.msra.mxu1 %v133_v0 }
  0x29   :  { %163 = vmatpush.msra.mxu1 %v132_v1  ;;  %v237_v1 = vld [vmem:[#allocation2 + $0x198] sm:$0xff] }
  0x2d   :  { %70 = vmatmul.f32.gmra.mxu0 %v34_v21 }
  0xa2   :  { %v68_v19 = vpop.f32.mrf.mxu0 }
  0xa3   :  { %v74_v20 = vsel %vm29_vm0, %v68_v19, 0.0 }
  0xa4   :  { %75 = vadd.xlane.f32.xlu0 %v74_v20 }
  0xaa   :  { %v71_v41 = vpop.f32.mrf.mxu0 }
 0x117   :  { %v76_v22 = vpop.xlane.xlu0 %75 }
 0x118   :  { %v77_v23 = vmul.f32 0.03125, %v76_v22 }
 0x11a   :  { %v78_v24 = vsub.f32 %v68_v19, %v77_v23  ;;  %v212_v23 = vld [vmem:[#allocation2 + $0x178] sm:$0xff] }
 0x11b   :  { %213 = vmatpush.msra.mxu2 %v212_v23 }
 0x11c   :  { %v79_v25 = vsel %vm29_vm0, %v78_v24, 0.0 }
 0x11d   :  { %v80_v26 = vmul.f32 %v79_v25, %v79_v25 }
 0x11f   :  { %81 = vadd.xlane.f32.xlu0 %v80_v26 }
 0x192   :  { %v82_v27 = vpop.xlane.xlu0 %81 }
 0x193   :  { %v83_v28 = vmul.f32 0.03125, %v82_v27 }
 0x195   :  { %v86_v29 = vadd.f32 1e-05, %v83_v28 }
 0x197   :  { %289 = vrsqrt.f32 %v86_v29  ;;  %vm93_vm2 = vweird.f32 %v86_v29 }
 0x19d   :  { %v290_v30 = vpop.eup %289 }
 0x19e   :  { %v88_v31 = vmul.f32 %v290_v30, %v86_v29  ;;  %vm94_vm1 = vweird.f32 %v290_v30  ;;  %v211_v29 = vld [vmem:[#allocation2 + $0x170] sm:$0xff] }
 0x19f   :  { %vm95_vm3 = vmor %vm93_vm2, %vm94_vm1  ;;  %214 = vmatpush.msra.mxu2 %v211_v29 }
 0x1a0   :  { %v89_v32 = vmul.f32 %v290_v30, %v88_v31  ;;  %v209_v31 = vld [vmem:[#allocation2 + $0x160] sm:$0xff] }
 0x1a2   :  { %v90_v33 = vmul.f32 0.5, %v89_v32  ;;  %v208_v32 = vld [vmem:[#allocation2 + $0x158] sm:$0xff] }
 0x1a4   :  { %v91_v34 = vsub.f32 1.5, %v90_v33  ;;  %v207_v33 = vld [vmem:[#allocation2 + $0x150] sm:$0xff] }
 0x1a6   :  { %v92_v35 = vmul.f32 %v290_v30, %v91_v34  ;;  %v206_v34 = vld [vmem:[#allocation2 + $0x148] sm:$0xff] }
 0x1a8   :  { %v96_v37 = vsel %vm95_vm3, %v290_v30, %v92_v35  ;;  %v210_v30 = vld [vmem:[#allocation2 + $0x168] sm:$0xff]  ;;  %v205_v35 = vld [vmem:[#allocation2 + $0x140] sm:$0xff] }
 0x1a9   :  { %v97_v38 = vmul.f32 %v96_v37, %v79_v25  ;;  %215 = vmatpush.msra.mxu2 %v210_v30  ;;  %v203_v37 = vld [vmem:[#allocation2 + $0x130] sm:$0xff] }
 0x1ab   :  { %v99_v40 = vmul.f32 %v283_v36, %v97_v38  ;;  %216 = vmatpush.msra.mxu2 %v209_v31  ;;  %v204_v36 = vld [vmem:[#allocation2 + $0x138] sm:$0xff]  ;;  %v202_v38 = vld [vmem:[#allocation2 + $0x128] sm:$0xff] }
 0x1ad   :  { %v101_v42 = vadd.f32 %v284_v39, %v99_v40  ;;  %217 = vmatpush.msra.mxu2 %v208_v32  ;;  %v201_v39 = vld [vmem:[#allocation2 + $0x120] sm:$0xff]  ;;  %v200_v40 = vld [vmem:[#allocation2 + $0x118] sm:$0xff] }
 0x1af   :  { %v102_v43 = vadd.f32 %v101_v42, %v71_v41  ;;  %218 = vmatpush.msra.mxu2 %v207_v33  ;;  %v199_v41 = vld [vmem:[#allocation2 + $0x110] sm:$0xff]  ;;  %v198_v42 = vld [vmem:[#allocation2 + $0x108] sm:$0xff] }
 0x1b1   :  { %v103_v44 = vsel %vm29_vm0, %v102_v43, 0.0  ;;  %219 = vmatpush.msra.mxu2 %v206_v34 }
 0x1b2   :  { %104 = vadd.xlane.f32.xlu1 %v103_v44  ;;  %v249_v44 = vld [vmem:[#allocation2 + $0x1f8] sm:$0xff] }
 0x1b3   :  { %220 = vmatpush.msra.mxu2 %v205_v35  ;;  %250 = vmatpush.msra.mxu3 %v249_v44 }
 0x1b5   :  { %221 = vmatpush.msra.mxu2 %v204_v36  ;;  %251 = vmatpush.msra.mxu3 %v248_v45 }
 0x1b7   :  { %222 = vmatpush.msra.mxu2 %v203_v37 }
 0x1b9   :  { %223 = vmatpush.msra.mxu2 %v202_v38 }
 0x1bb   :  { %224 = vmatpush.msra.mxu2 %v201_v39 }
 0x1bd   :  { %225 = vmatpush.msra.mxu2 %v200_v40 }
 0x1bf   :  { %226 = vmatpush.msra.mxu2 %v199_v41 }
 0x1c1   :  { %227 = vmatpush.msra.mxu2 %v198_v42 }
 0x225   :  { %v105_v46 = vpop.xlane.xlu1 %104 }
 0x226   :  { %v106_v47 = vmul.f32 0.03125, %v105_v46 }
 0x228   :  { %v107_v48 = vsub.f32 %v102_v43, %v106_v47  ;;  %v197_v43 = vld [vmem:[#allocation2 + $0x100] sm:$0xff]  ;;  %v247_v47 = vld [vmem:[#allocation2 + $0x1e8] sm:$0xff] }
 0x229   :  { %228 = vmatpush.msra.mxu2 %v197_v43  ;;  %252 = vmatpush.msra.mxu3 %v247_v47 }
 0x22a   :  { %v108_v49 = vsel %vm29_vm0, %v107_v48, 0.0 }
 0x22b   :  { %v109_v50 = vmul.f32 %v108_v49, %v108_v49 }
 0x22d   :  { %110 = vadd.xlane.f32.xlu1 %v109_v50 }
 0x2a0   :  { %v111_v2 = vpop.xlane.xlu1 %110 }
 0x2a1   :  { %v112_v3 = vmul.f32 0.03125, %v111_v2  ;;  %v287_v2 = vld [vmem:[#allocation2 + $0x204] ss:$0 sm:$0xff] }
 0x2a3   :  { %v115_v4 = vadd.f32 1e-05, %v112_v3 }
 0x2a5   :  { %291 = vrsqrt.f32 %v115_v4  ;;  %vm122_vm5 = vweird.f32 %v115_v4 }
 0x2ab   :  { %v292_v5 = vpop.eup %291 }
 0x2ac   :  { %v117_v6 = vmul.f32 %v292_v5, %v115_v4  ;;  %vm123_vm4 = vweird.f32 %v292_v5  ;;  %v236_v4 = vld [vmem:[#allocation2 + $0x190] sm:$0xff] }
 0x2ad   :  { %vm124_vm6 = vmor %vm122_vm5, %vm123_vm4 }
 0x2ae   :  { %v118_v7 = vmul.f32 %v292_v5, %v117_v6  ;;  %v288_v6 = vld [vmem:[#allocation2 + $0x205] ss:$0 sm:$0xff] }
 0x2b0   :  { %v119_v8 = vmul.f32 0.5, %v118_v7 }
 0x2b2   :  { %v120_v9 = vsub.f32 1.5, %v119_v8 }
 0x2b4   :  { %v121_v10 = vmul.f32 %v292_v5, %v120_v9 }
 0x2b6   :  { %v125_v12 = vsel %vm124_vm6, %v292_v5, %v121_v10 }
 0x2b7   :  { %v126_v13 = vmul.f32 %v125_v12, %v108_v49  ;;  %v246_v49 = vld [vmem:[#allocation2 + $0x1e0] sm:$0xff] }
 0x2b8   :  { %253 = vmatpush.msra.mxu3 %v246_v49  ;;  %v234_v12 = vld [vmem:[#allocation2 + $0x180] sm:$0xff] }
 0x2b9   :  { %v128_v15 = vmul.f32 %v285_v11, %v126_v13  ;;  %v235_v11 = vld [vmem:[#allocation2 + $0x188] sm:$0xff] }
 0x2ba   :  { %254 = vmatpush.msra.mxu3 %v245_v51 }
 0x2bb   :  { %v130_v19 = vadd.f32 %v286_v14, %v128_v15 }
 0x2bc   :  { %255 = vmatpush.msra.mxu3 %v244_v52 }
 0x2bd   :  { %v131_v20 = vsel %vm29_vm0, %v130_v19, %v361_v17 }
 0x2be   :  { %164 = vmatmul.f32.vlgmr.msra.gmra.mxu1 %v131_v20  ;;  %256 = vmatpush.msra.mxu3 %v243_v53 }
 0x2c0   :  { %257 = vmatpush.msra.mxu3 %v242_v54 }
 0x2c2   :  { %258 = vmatpush.msra.mxu3 %v241_v57 }
 0x2c4   :  { %259 = vmatpush.msra.mxu3 %v240_v59 }
 0x2c6   :  { %260 = vmatpush.msra.mxu3 %v239_v61 }
 0x2c8   :  { %261 = vmatpush.msra.mxu3 %v238_v63 }
 0x2ca   :  { %262 = vmatpush.msra.mxu3 %v237_v1 }
 0x2cc   :  { %263 = vmatpush.msra.mxu3 %v236_v4 }
 0x2ce   :  { %264 = vmatpush.msra.mxu3 %v235_v11 }
 0x2d0   :  { %265 = vmatpush.msra.mxu3 %v234_v12 }
 0x33b   :  { %v366_v21 = vpop.f32.mrf.mxu1 }
 0x33c   :  { %v168_v22 = vsel %vm29_vm0, %v366_v21, 0.0 }
 0x33d   :  { %169 = vadd.xlane.f32.xlu2 %v168_v22 }
 0x3b0   :  { %v170_v24 = vpop.xlane.xlu2 %169 }
 0x3b1   :  { %v171_v25 = vmul.f32 0.03125, %v170_v24 }
 0x3b3   :  { %v172_v26 = vsub.f32 %v366_v21, %v171_v25 }
 0x3b5   :  { %v374_v27 = vsel %vm29_vm0, %v172_v26, 0.0 }
 0x3b6   :  { %v174_v28 = vmul.f32 %v374_v27, %v374_v27 }
 0x3b8   :  { %175 = vadd.xlane.f32.xlu2 %v174_v28 }
 0x42b   :  { %v176_v46 = vpop.xlane.xlu2 %175 }
 0x42c   :  { %v177_v48 = vmul.f32 0.03125, %v176_v46 }
 0x42e   :  { %v180_v50 = vadd.f32 1e-05, %v177_v48 }
 0x430   :  { %293 = vrsqrt.f32 %v180_v50  ;;  %vm187_vm9 = vweird.f32 %v180_v50 }
 0x436   :  { %v294_v55 = vpop.eup %293 }
 0x437   :  { %v182_v56 = vmul.f32 %v294_v55, %v180_v50  ;;  %vm188_vm8 = vweird.f32 %v294_v55 }
 0x438   :  { %vm189_vm10 = vmor %vm187_vm9, %vm188_vm8 }
 0x439   :  { %v183_v58 = vmul.f32 %v294_v55, %v182_v56 }
 0x43b   :  { %v184_v60 = vmul.f32 0.5, %v183_v58 }
 0x43d   :  { %v185_v62 = vsub.f32 1.5, %v184_v60 }
 0x43f   :  { %v186_v0 = vmul.f32 %v294_v55, %v185_v62 }
 0x441   :  { %v190_v3 = vsel %vm189_vm10, %v294_v55, %v186_v0 }
 0x442   :  { %v191_v5 = vmul.f32 %v190_v3, %v374_v27 }
 0x444   :  { %v193_v7 = vmul.f32 %v287_v2, %v191_v5 }
 0x446   :  { %v195_v8 = vadd.f32 %v288_v6, %v193_v7 }
 0x448   :  { %v196_v9 = vsel %vm29_vm0, %v195_v8, %v361_v17  ;;  %v270_v10 = vsel %vm29_vm0, %v195_v8, %v366_v21 }
 0x449   :  { %229 = vmatmul.f32.vlgmr.msra.gmra.mxu2 %v196_v9  ;;  %271 = vst [vmem:[%s393_s2] sm:$0xff] %v270_v10 }
 0x4cc   :  { %v230_v13 = vpop.f32.mrf.mxu2 }
 0x4cd   :  { %v233_v14 = vmax.f32 %v230_v13, 0.0 }
 0x4cf   :  { %266 = vmatmul.f32.vlgmr.msra.gmra.mxu3 %v233_v14 }
 0x552   :  { %v267_v15 = vpop.f32.mrf.mxu3 }
 0x553   :  { %272 = vst [vmem:[%s393_s2 + $0x8] sm:$0xff] %v267_v15 }
 0x554   :  { %277 = vsyncpa [#allocation3], 1 }

</bundles_post_ra>
